<compile_context>
chip_gen: v7x
topology: tpu7x:2x2x1
jax: 0.10.0
libtpu: 0.0.40
codegen_flags: <defaults>
</compile_context>

<pallas_src>
import math
from functools import partial

import jax
import jax.numpy as jnp
from jax.experimental import pallas as pl
from jax.experimental.pallas import tpu as pltpu


def _time_embedding_kernel(t_ref, freqs_ref, out_ref, *, half_dim: int,
                           lane_aligned: bool):
    # t_ref:     (TILE_B, 1)           f32 VMEM
    # freqs_ref: (TILE_B, half_dim)    f32 VMEM (pre-broadcast constant freqs)
    # out_ref:   (TILE_B, 2*half_dim)  out_dtype VMEM
    args = t_ref[...] * freqs_ref[...]            # (TILE_B, half_dim), VPU
    s = jnp.sin(args)
    c = jnp.cos(args)
    if lane_aligned:
        # Two lane-dense slice stores (half_dim is a multiple of 128).
        out_ref[:, :half_dim] = s.astype(out_ref.dtype)
        out_ref[:, half_dim:] = c.astype(out_ref.dtype)
    else:
        # Fallback: single store of the concatenated slab (avoids unaligned vst).
        out_ref[...] = jnp.concatenate([s, c], axis=-1).astype(out_ref.dtype)


def time_embedding(t: jax.Array, dim: int, *, out_dtype=jnp.float32,
                   tile_b: int | None = None) -> jax.Array:
    """Equivalent of TimeEmbedding(dim)(t) from the PyTorch reference.

    t: (B,) array of timesteps.
    Returns: (B, dim) = concat(sin(t*freq), cos(t*freq), axis=-1) in out_dtype.
    All intermediate math is f32; out_dtype only affects the final store.
    """
    assert dim % 2 == 0, "dim must be even"
    half_dim = dim // 2
    assert half_dim >= 2, "dim must be >= 4"

    B = t.shape[0]

    # Tile selection: one block for the whole batch when it fits comfortably,
    # otherwise big (multiple-of-8) row tiles so each grid step does real work.
    if tile_b is None:
        tile_b = B if B <= 2048 else 2048
    tile_b = min(tile_b, B)
    if tile_b < B and tile_b % 8 != 0:
        tile_b = max(8, (tile_b // 8) * 8)
    num_tiles = pl.cdiv(B, tile_b)

    # Compile-time constant frequencies, pre-broadcast to the block row count
    # so the in-kernel multiply needs no sublane broadcast.
    log_scale = math.log(10000.0) / (half_dim - 1)
    freqs_row = jnp.exp(jnp.arange(half_dim, dtype=jnp.float32) * (-log_scale))
    freqs = jnp.broadcast_to(freqs_row[None, :], (tile_b, half_dim))

    t2d = t.astype(jnp.float32).reshape(B, 1)

    lane_aligned = (half_dim % 128 == 0)

    out = pl.pallas_call(
        partial(_time_embedding_kernel, half_dim=half_dim,
                lane_aligned=lane_aligned),
        out_shape=jax.ShapeDtypeStruct((B, dim), out_dtype),
        grid=(num_tiles,),
        in_specs=[
            pl.BlockSpec((tile_b, 1), lambda i: (i, 0)),          # timesteps
            pl.BlockSpec((tile_b, half_dim), lambda i: (0, 0)),   # constant freqs
        ],
        out_specs=pl.BlockSpec((tile_b, dim), lambda i: (i, 0)),
        compiler_params=pltpu.CompilerParams(
            dimension_semantics=("parallel",),  # row tiles are independent
        ),
    )(t2d, freqs)

    return out


def _reference(t: jax.Array, dim: int) -> jax.Array:
    # Pure-JAX reference mirroring the PyTorch forward exactly.
    half_dim = dim // 2
    emb = math.log(10000.0) / (half_dim - 1)
    emb = jnp.exp(jnp.arange(half_dim, dtype=jnp.float32) * -emb)
    emb = t.astype(jnp.float32)[:, None] * emb[None, :]
    return jnp.concatenate([jnp.sin(emb), jnp.cos(emb)], axis=-1)


if __name__ == "__main__":
    key = jax.random.PRNGKey(0)
    DIM = 512  # time_emb_dim in the UNet spec -> half_dim = 256 (lane-dense)

    # --- primary case: the model's real batch size, single grid step ---
    B = 16
    t = jax.random.uniform(key, (B,), dtype=jnp.float32) * 1000.0
    out = jax.block_until_ready(time_embedding(t, DIM))
    ref = _reference(t, DIM)
    assert out.shape == (B, DIM), out.shape
    assert jnp.allclose(out, ref, atol=5e-5, rtol=1e-5), \
        float(jnp.max(jnp.abs(out - ref)))

    # --- ragged last block: B not a multiple of tile_b, no wrapper pad/slice ---
    B2 = 20
    t2 = jax.random.uniform(jax.random.PRNGKey(1), (B2,), dtype=jnp.float32) * 1000.0
    out2 = jax.block_until_ready(time_embedding(t2, DIM, tile_b=8))
    ref2 = _reference(t2, DIM)
    assert out2.shape == (B2, DIM), out2.shape
    assert jnp.allclose(out2, ref2, atol=5e-5, rtol=1e-5), \
        float(jnp.max(jnp.abs(out2 - ref2)))

    # --- optional bf16 output (cast at store, math stays f32) ---
    out_bf16 = jax.block_until_ready(time_embedding(t, DIM, out_dtype=jnp.bfloat16))
    assert out_bf16.dtype == jnp.bfloat16
    assert jnp.allclose(out_bf16.astype(jnp.float32), ref, atol=2e-2), \
        float(jnp.max(jnp.abs(out_bf16.astype(jnp.float32) - ref)))

    print("KERNEL_OK")
</pallas_src>

<mosaic_0001>
module attributes {stable_mosaic.version = 11 : i64} {
  func.func @_time_embedding_kernel(%arg0: i32, %arg1: memref<16x1xf32, #tpu.memory_space<vmem>>, %arg2: memref<16x256xf32, #tpu.memory_space<vmem>>, %arg3: memref<16x512xf32, #tpu.memory_space<vmem>>) attributes {dimension_semantics = [#tpu.dimension_semantics<parallel>], iteration_bounds = array<i64: 1>, scalar_prefetch = 0 : i64, scratch_operands = 0 : i64, tpu.core_type = #tpu.core_type<tc>, window_params = [{transform_indices = @transform_0, window_bounds = array<i64: 16, 1>}, {pipeline_mode = #tpu.pipeline_mode<synchronous>, transform_indices = @transform_1, window_bounds = array<i64: 16, 256>}, {transform_indices = @transform_2, window_bounds = array<i64: 16, 512>}]} {
    %c0 = arith.constant 0 : index
    %c0_0 = arith.constant 0 : index
    %0 = vector.load %arg1[%c0, %c0_0] : memref<16x1xf32, #tpu.memory_space<vmem>>, vector<16x1xf32>
    %c0_1 = arith.constant 0 : index
    %c0_2 = arith.constant 0 : index
    %1 = vector.load %arg2[%c0_1, %c0_2] : memref<16x256xf32, #tpu.memory_space<vmem>>, vector<16x256xf32>
    %2 = vector.broadcast %0 : vector<16x1xf32> to vector<16x256xf32>
    %3 = arith.mulf %2, %1 : vector<16x256xf32>
    %4 = math.sin %3 : vector<16x256xf32>
    %5 = math.cos %3 : vector<16x256xf32>
    %c0_3 = arith.constant 0 : index
    %c0_4 = arith.constant 0 : index
    %6 = vector.load %arg3[%c0_3, %c0_4] : memref<16x512xf32, #tpu.memory_space<vmem>>, vector<16x256xf32>
    tpu.vector_store %arg3[%c0_3, %c0_4], %4 {strides = array<i32>} : memref<16x512xf32, #tpu.memory_space<vmem>>, vector<16x256xf32>,
    %c0_5 = arith.constant 0 : index
    %c256 = arith.constant 256 : index
    %7 = vector.load %arg3[%c0_5, %c256] : memref<16x512xf32, #tpu.memory_space<vmem>>, vector<16x256xf32>
    tpu.vector_store %arg3[%c0_5, %c256], %5 {strides = array<i32>} : memref<16x512xf32, #tpu.memory_space<vmem>>, vector<16x256xf32>,
    return
  }
  func.func @transform_0(%arg0: i32) -> (i32, i32) {
    %c0_i32 = arith.constant 0 : i32
    %c0_i32_0 = arith.constant 0 : i32
    return %arg0, %c0_i32 : i32, i32
  }
  func.func @transform_1(%arg0: i32) -> (i32, i32) {
    %c0_i32 = arith.constant 0 : i32
    %c0_i32_0 = arith.constant 0 : i32
    %c0_i32_1 = arith.constant 0 : i32
    return %c0_i32, %c0_i32_0 : i32, i32
  }
  func.func @transform_2(%arg0: i32) -> (i32, i32) {
    %c0_i32 = arith.constant 0 : i32
    %c0_i32_0 = arith.constant 0 : i32
    return %arg0, %c0_i32 : i32, i32
  }
}

</mosaic_0001>

<bundles_post_ra>
// kernel: tpu_custom_call.1
= control target key start
LH: loop header
LB: loop body
LE: loop exit
PB: predicated region body
PF: predicated region fallthrough
CT: control target
= control target key end

     0   :  { %7 = vsyncpa [#allocation3], 0  ;;  %s1395_s0 = inlined_call_operand.vmem [shape: f32[16,1], index: 0, kind: input, shape index: {}]   ;;  %s1396_s1 = inlined_call_operand.hbm [shape: f32[16,256], index: 1, kind: input, shape index: {}]   ;;  %s1397_s2 = inlined_call_operand.hbm [shape: f32[16,512], index: 2, kind: output, shape index: {}]  }
   0x1   :  { %8 = vsyncpa [#allocation4], 0  ;;  %s1025_s9 = smov [#allocation2]   ;;  %s977_s13 = scalar_lea.hbm %s1396_s1, 512 }
   0x2   :  { %s16_s10 = sshll.u32 %s1025_s9, 4  ;;  %p978_p0 = scmp.ne.s32.totalorder %s1396_s1, %s977_s13  ;;  %s17_s10 = int_to_ptr.vmem [resolvable:$true] %s16_s10 }
   0x3   :  { %p981_p1 = scmp.lt.u32.totalorder %s977_s13, %s1396_s1 }
   0x5   :  { %p983_p2 = pnand %p981_p1, %p978_p0 }
   0x7   :  { %986 = shalt.err (!%p983_p2)
}
   0x8   :  { %s987_s18 = scalar_lea.vmem %s17_s10, 512  ;;  %p992_p4 = scmp.lt.s32.totalorder %s17_s10, %s17_s10 }
   0x9   :  { %p988_p3 = scmp.ne.s32.totalorder %s17_s10, %s987_s18  ;;  %p993_p5 = scmp.lt.s32.totalorder %s987_s18, %s987_s18 }
   0xb   :  { %p994_p6 = por %p993_p5, %p992_p4 }
   0xd   :  { %p995_p7 = pnand %p994_p6, %p988_p3 }
   0xf   :  { %998 = shalt.err (!%p995_p7)
}
  0x10   :  { %s1026_s19 = smov 256   ;;  %s1027_s20 = smov 16  }
  0x11   :  { %22 = dma.hbm_to_vmem [thread:$0]  %s1396_s1, 512, %s17_s10, [#allocation3], %s1026_s19, %s1026_s19, %s1027_s20  }
  0x12   :  { %1021 = dma.done.wait [#allocation3], 512  }
  0x13   :  { %1022 = vsyncadd [#allocation3], 4294966784  ;;  %v1028_v0 = vmov 0   ;;  %v26_v1 = vld [vmem:[%s1395_s0] sm:$0xff]  ;;  %v27_v2 = vld [vmem:[%s1395_s0 + $0x8] sm:$0xff]  ;;  %s1035_s0 = smov [#allocation5]  }
  0x14   :  { %960 = vset.pattern.permute.xlu0 %v1028_v0  ;;  %v28_v3 = vld [vmem:[#allocation2] sm:$0xff]  ;;  %v29_v4 = vld [vmem:[#allocation2 + $0x8] sm:$0xff]  ;;  %v30_v8 = vld [vmem:[#allocation2 + $0x10] sm:$0xff]  ;;  %v1029_v38 = vmov 683565275   ;;  %s887_s1 = sshll.u32 %s1035_s0, 4  ;;  %s888_s1 = int_to_ptr.vmem [resolvable:$true] %s887_s1 }
  0x15   :  { %34 = vperm.xlu0 %960, %v26_v1   ;;  %v1030_v42 = vmov 2475754826   ;;  %v1031_v44 = vmov 2131351028   ;;  %v1032_v46 = vmov 2102212464   ;;  %p1004_p9 = scmp.lt.s32.totalorder %s888_s1, %s888_s1 }
  0x16   :  { %v1033_v48 = vmov 920167782   ;;  %v1034_v55 = vmov 1326507024   ;;  %s999_s27 = scalar_lea.vmem %s888_s1, 1024 }
  0x17   :  { %p1000_p8 = scmp.ne.s32.totalorder %s888_s1, %s999_s27  ;;  %p1005_p10 = scmp.lt.s32.totalorder %s999_s27, %s999_s27 }
  0x19   :  { %39 = vperm.xlu0 %960, %v27_v2   ;;  %p1006_p11 = por %p1005_p10, %p1004_p9 }
  0x1b   :  { %p1007_p12 = pnand %p1006_p11, %p1000_p8 }
  0x94   :  { %v35_v5 = vpop.permute.xlu0 %34 }
  0x95   :  { %v1071_v6 = vmul.f32 %v35_v5, %v28_v3  ;;  %v1073_v7 = vmul.f32 %v35_v5, %v29_v4 }
  0x97   :  { %v46_v9 = vand.u32 2147483647, %v1071_v6  ;;  %v49_v10 = vand.u32 2139095040, %v1071_v6  ;;  %v150_v12 = vand.u32 2147483647, %v1073_v7  ;;  %v153_v13 = vand.u32 2139095040, %v1073_v7 }
  0x98   :  { %v1077_v11 = vpop.permute.xlu0 %39  ;;  %vm48_vm13 = vcmp.lt.s32.totalorder %v1071_v6, 0  ;;  %vm152_vm14 = vcmp.lt.s32.totalorder %v1073_v7, 0 }
  0x99   :  { %v1082_v14 = vmul.f32 %v1077_v11, %v30_v8  ;;  %v50_v15 = vshrl.u32 %v49_v10, 23  ;;  %v53_v16 = vand.u32 8388607, %v46_v9  ;;  %v154_v17 = vshrl.u32 %v153_v13, 23 }
  0x9a   :  { %v157_v19 = vand.u32 8388607, %v150_v12 }
  0x9b   :  { %v899_v18 = vadd.s32 4294967169, %v50_v15  ;;  %v903_v20 = vadd.s32 4294967169, %v154_v17  ;;  %v257_v21 = vand.u32 2139095040, %v1082_v14  ;;  %v254_v23 = vand.u32 2147483647, %v1082_v14 }
  0x9c   :  { %v54_v24 = vor.u32 8388608, %v53_v16  ;;  %v158_v25 = vor.u32 8388608, %v157_v19 }
  0x9d   :  { %v56_v22 = vadd.s32 1, %v899_v18  ;;  %v160_v26 = vadd.s32 1, %v903_v20  ;;  %v258_v27 = vshrl.u32 %v257_v21, 23  ;;  %v1098_v36 = vand.u32 8388607, %v254_v23 }
  0x9e   :  { %v1090_v33 = vshll.u32 %v54_v24, 8  ;;  %v1094_v35 = vshll.u32 %v158_v25, 8 }
  0x9f   :  { %vm57_vm0 = vcmp.gt.s32.totalorder %v56_v22, 0  ;;  %vm161_vm1 = vcmp.gt.s32.totalorder %v160_v26, 0  ;;  %v907_v29 = vadd.s32 4294967169, %v258_v27 }
  0xa0   :  { %v58_v28 = vsel %vm57_vm0, %v56_v22, 0  ;;  %v162_v32 = vsel %vm161_vm1, %v160_v26, 0 }
  0xa1   :  { %v59_v30 = vshrl.u32 %v58_v28, 5  ;;  %v60_v31 = vand.u32 31, %v58_v28  ;;  %v1092_v34 = vshrl.u32 %v162_v32, 5  ;;  %v164_v40 = vand.u32 31, %v162_v32 }
  0xa2   :  { %v1101_v41 = vadd.s32 1, %v907_v29 }
  0xa3   :  { %v61_v37 = vsub.s32 32, %v60_v31  ;;  %v63_v39 = vshll.u32 %v1029_v38, %v60_v31  ;;  %v66_v43 = vshll.u32 %v1030_v42, %v60_v31  ;;  %v69_v45 = vshll.u32 %v1031_v44, %v60_v31 }
  0xa4   :  { %v72_v47 = vshll.u32 %v1032_v46, %v60_v31  ;;  %v75_v49 = vshll.u32 %v1033_v48, %v60_v31  ;;  %vm78_vm2 = vcmp.lt.s32.totalorder %v59_v30, 1  ;;  %vm79_vm3 = vcmp.lt.s32.totalorder %v59_v30, 2 }
  0xa5   :  { %v64_v50 = vshrl.u32 %v1030_v42, %v61_v37  ;;  %v67_v51 = vshrl.u32 %v1031_v44, %v61_v37  ;;  %v70_v52 = vshrl.u32 %v1032_v46, %v61_v37  ;;  %v62_v53 = vshrl.u32 %v1029_v38, %v61_v37 }
  0xa6   :  { %v73_v54 = vshrl.u32 %v1033_v48, %v61_v37  ;;  %v76_v56 = vshrl.u32 %v1034_v55, %v61_v37  ;;  %v165_v60 = vsub.s32 32, %v164_v40  ;;  %vm80_vm4 = vcmp.lt.s32.totalorder %v59_v30, 3 }
  0xa7   :  { %v65_v57 = vor.u32 %v64_v50, %v63_v39  ;;  %v68_v58 = vor.u32 %v67_v51, %v66_v43  ;;  %v71_v59 = vor.u32 %v70_v52, %v69_v45  ;;  %vm81_vm5 = vcmp.lt.s32.totalorder %v59_v30, 4 }
  0xa8   :  { %v74_v61 = vor.u32 %v73_v54, %v72_v47  ;;  %v77_v62 = vor.u32 %v76_v56, %v75_v49  ;;  %v167_v8 = vshll.u32 %v1029_v38, %v164_v40  ;;  %v168_v15 = vshrl.u32 %v1030_v42, %v165_v60 }
  0xa9   :  { %v82_v63 = vsel %vm78_vm2, %v62_v53, %v65_v57  ;;  %v83_v0 = vsel %vm81_vm5, %v71_v59, 2102212464  ;;  %v86_v1 = vsel %vm78_vm2, %v65_v57, %v68_v58  ;;  %v90_v2 = vsel %vm78_vm2, %v68_v58, %v71_v59 }
  0xaa   :  { %v84_v3 = vsel %vm80_vm4, %v68_v58, %v83_v0  ;;  %v87_v4 = vsel %vm81_vm5, %v74_v61, 920167782  ;;  %v91_v5 = vsel %vm81_vm5, %v77_v62, 1326507024  ;;  %v170_v16 = vshll.u32 %v1030_v42, %v164_v40 }
  0xab   :  { %v88_v10 = vsel %vm80_vm4, %v71_v59, %v87_v4  ;;  %v92_v13 = vsel %vm80_vm4, %v74_v61, %v91_v5  ;;  %v85_v17 = vsel %vm79_vm3, %v82_v63, %v84_v3  ;;  %v171_v20 = vshrl.u32 %v1031_v44, %v165_v60 }
  0xac   :  { %v89_v18 = vsel %vm79_vm3, %v86_v1, %v88_v10  ;;  %v93_v19 = vsel %vm79_vm3, %v90_v2, %v92_v13  ;;  %v169_v26 = vor.u32 %v168_v15, %v167_v8  ;;  %v173_v28 = vshll.u32 %v1031_v44, %v164_v40  ;;  %v31_v2 = vld [vmem:[#allocation2 + $0x18] sm:$0xff] }
  0xad   :  { %v1124_v21 = vmul.u32.u64.low %v1090_v33, %v93_v19  ;;  %v1125_v22 = vmul.u32.u64.high %v1090_v33, %v93_v19, %v1124_v21  ;;  %v1128_v24 = vmul.u32.u64.low %v1090_v33, %v89_v18  ;;  %v1129_v25 = vmul.u32.u64.high %v1090_v33, %v89_v18, %v1128_v24 }
  0xae   :  { %v172_v27 = vor.u32 %v171_v20, %v170_v16  ;;  %v174_v29 = vshrl.u32 %v1032_v46, %v165_v60  ;;  %v166_v30 = vshrl.u32 %v1029_v38, %v165_v60  ;;  %v176_v31 = vshll.u32 %v1032_v46, %v164_v40 }
  0xaf   :  { %v177_v32 = vshrl.u32 %v1033_v48, %v165_v60  ;;  %v180_v37 = vshrl.u32 %v1034_v55, %v165_v60  ;;  %v101_v39 = vmul.u32 %v1090_v33, %v85_v17  ;;  %v179_v45 = vshll.u32 %v1033_v48, %v164_v40 }
  0xb0   :  { %v175_v43 = vor.u32 %v174_v29, %v173_v28  ;;  %vm182_vm6 = vcmp.lt.s32.totalorder %v1092_v34, 1  ;;  %vm103_vm7 = vc.u32 %v1125_v22, %v1128_v24  ;;  %v104_v47 = vadd.s32 1, %v1129_v25 }
  0xb1   :  { %v178_v49 = vor.u32 %v177_v32, %v176_v31  ;;  %vm183_vm8 = vcmp.lt.s32.totalorder %v1092_v34, 2  ;;  %v181_v50 = vor.u32 %v180_v37, %v179_v45  ;;  %vm184_vm9 = vcmp.lt.s32.totalorder %v1092_v34, 3 }
  0xb2   :  { %vm185_vm10 = vcmp.lt.s32.totalorder %v1092_v34, 4  ;;  %v190_v51 = vsel %vm182_vm6, %v169_v26, %v172_v27  ;;  %v105_v33 = vsel %vm103_vm7, %v104_v47, %v1129_v25  ;;  %v194_v53 = vsel %vm182_vm6, %v172_v27, %v175_v43 }
  0xb3   :  { %v187_v52 = vsel %vm185_vm10, %v175_v43, 2102212464  ;;  %v191_v40 = vsel %vm185_vm10, %v178_v49, 920167782  ;;  %v106_v54 = vadd.s32 %v105_v33, %v101_v39  ;;  %v186_v56 = vsel %vm182_vm6, %v166_v30, %v169_v26 }
  0xb4   :  { %v192_v57 = vsel %vm184_vm9, %v175_v43, %v191_v40  ;;  %v195_v58 = vsel %vm185_vm10, %v181_v50, 1326507024  ;;  %v188_v59 = vsel %vm184_vm9, %v172_v27, %v187_v52  ;;  %vm265_vm11 = vcmp.gt.s32.totalorder %v1101_v41, 0 }
  0xb5   :  { %v193_v60 = vsel %vm183_vm8, %v190_v51, %v192_v57  ;;  %v196_v61 = vsel %vm184_vm9, %v178_v49, %v195_v58  ;;  %v107_v62 = vadd.s32 536870912, %v106_v54  ;;  %v266_v5 = vsel %vm265_vm11, %v1101_v41, 0 }
  0xb6   :  { %v197_v63 = vsel %vm183_vm8, %v194_v53, %v196_v61  ;;  %v1154_v0 = vmul.u32.u64.low %v1094_v35, %v193_v60  ;;  %v1155_v1 = vmul.u32.u64.high %v1094_v35, %v193_v60, %v1154_v0  ;;  %v189_v10 = vsel %vm183_vm8, %v186_v56, %v188_v59 }
  0xb7   :  { %v1159_v3 = vmul.u32.u64.low %v1094_v35, %v197_v63  ;;  %v1160_v4 = vmul.u32.u64.high %v1094_v35, %v197_v63, %v1159_v3  ;;  %v1163_v8 = vshrl.u32 %v107_v62, 30  ;;  %v268_v13 = vand.u32 31, %v266_v5 }
  0xb8   :  { %v1168_v15 = vmul.f32 %v1077_v11, %v31_v2  ;;  %v208_v17 = vadd.s32 1, %v1155_v1  ;;  %v262_v18 = vor.u32 8388608, %v1098_v36  ;;  %v205_v19 = vmul.u32 %v1094_v35, %v189_v10 }
  0xb9   :  { %v109_v16 = vshll.u32 %v1163_v8, 30  ;;  %vm207_vm12 = vc.u32 %v1160_v4, %v1154_v0  ;;  %v269_v41 = vsub.s32 32, %v268_v13  ;;  %v102_v29 = vadd.s32 %v1128_v24, %v1125_v22 }
  0xba   :  { %v209_v34 = vsel %vm207_vm12, %v208_v17, %v1155_v1  ;;  %v1180_v25 = vshll.u32 %v262_v18, 8  ;;  %v358_v26 = vand.u32 2147483647, %v1168_v15  ;;  %v361_v28 = vand.u32 2139095040, %v1168_v15 }
  0xbb   :  { %v1176_v20 = vsub.s32 %v106_v54, %v109_v16  ;;  %v210_v21 = vadd.s32 %v209_v34, %v205_v19  ;;  %v272_v36 = vshrl.u32 %v1030_v42, %v269_v41  ;;  %v275_v35 = vshrl.u32 %v1031_v44, %v269_v41 }
  0xbc   :  { %v278_v31 = vshrl.u32 %v1032_v46, %v269_v41  ;;  %v281_v32 = vshrl.u32 %v1033_v48, %v269_v41  ;;  %v267_v39 = vshrl.u32 %v266_v5, 5  ;;  %v271_v43 = vshll.u32 %v1029_v38, %v268_v13 }
  0xbd   :  { %v112_v11 = vsub.s32 0, %v1176_v20  ;;  %v211_v27 = vadd.s32 536870912, %v210_v21  ;;  %v274_v45 = vshll.u32 %v1030_v42, %v268_v13  ;;  %v277_v49 = vshll.u32 %v1031_v44, %v268_v13 }
  0xbe   :  { %v280_v50 = vshll.u32 %v1032_v46, %v268_v13  ;;  %v284_v22 = vshrl.u32 %v1034_v55, %v269_v41  ;;  %v132_v24 = vsub.s32 4, %v1163_v8  ;;  %v273_v33 = vor.u32 %v272_v36, %v271_v43 }
  0xbf   :  { %v900_v30 = vmin.u32 %v112_v11, %v1176_v20  ;;  %v212_v37 = vshrl.u32 %v211_v27, 30  ;;  %v276_v52 = vor.u32 %v275_v35, %v274_v45  ;;  %v279_v53 = vor.u32 %v278_v31, %v277_v49 }
  0xc0   :  { %v282_v54 = vor.u32 %v281_v32, %v280_v50  ;;  %v283_v56 = vshll.u32 %v1033_v48, %v268_v13  ;;  %v270_v59 = vshrl.u32 %v1029_v38, %v269_v41  ;;  %vm286_vm15 = vcmp.lt.s32.totalorder %v267_v39, 1 }
  0xc1   :  { %v114_v47 = vclz %v900_v30  ;;  %v213_v51 = vshll.u32 %v212_v37, 30  ;;  %v236_v58 = vsub.s32 4, %v212_v37  ;;  %vm287_vm1 = vcmp.lt.s32.totalorder %v267_v39, 2 }
  0xc2   :  { %v285_v60 = vor.u32 %v284_v22, %v283_v56  ;;  %vm288_vm2 = vcmp.lt.s32.totalorder %v267_v39, 3  ;;  %vm1205_vm3 = vcmp.le.f32.partialorder %v46_v9, 0.7853982  ;;  %vm289_vm4 = vcmp.lt.s32.totalorder %v267_v39, 4 }
  0xc3   :  { %v901_v40 = vadd.s32 4294967294, %v114_v47  ;;  %v1200_v57 = vsub.s32 %v210_v21, %v213_v51  ;;  %v294_v1 = vsel %vm286_vm15, %v273_v33, %v276_v52  ;;  %vm1213_vm5 = vcmp.le.f32.partialorder %v150_v12, 0.7853982 }
  0xc4   :  { %v291_v10 = vsel %vm289_vm4, %v279_v53, 2102212464  ;;  %v295_v13 = vsel %vm289_vm4, %v282_v54, 920167782  ;;  %v298_v18 = vsel %vm286_vm15, %v276_v52, %v279_v53  ;;  %v299_v21 = vsel %vm289_vm4, %v285_v60, 1326507024 }
  0xc5   :  { %vm902_vm0 = vcmp.lt.s32.totalorder %v901_v40, 0  ;;  %v216_v63 = vsub.s32 0, %v1200_v57  ;;  %v296_v17 = vsel %vm288_vm2, %v279_v53, %v295_v13  ;;  %v133_v12 = vsel %vm48_vm13, %v132_v24, %v1163_v8 }
  0xc6   :  { %v117_v62 = vsel %vm902_vm0, 0, %v901_v40  ;;  %v297_v34 = vsel %vm287_vm1, %v294_v1, %v296_v17  ;;  %v290_v27 = vsel %vm286_vm15, %v270_v59, %v273_v33  ;;  %v362_v36 = vshrl.u32 %v361_v28, 23 }
  0xc7   :  { %v118_v2 = vsub.s32 32, %v117_v62  ;;  %v122_v3 = vsub.s32 4294967266, %v117_v62  ;;  %v119_v9 = vshll.u32 %v1176_v20, %v117_v62  ;;  %v904_v16 = vmin.u32 %v216_v63, %v1200_v57 }
  0xc8   :  { %v292_v30 = vsel %vm288_vm2, %v276_v52, %v291_v10  ;;  %v300_v31 = vsel %vm288_vm2, %v282_v54, %v299_v21  ;;  %v1230_v43 = vmul.u32.u64.low %v1180_v25, %v297_v34  ;;  %v1231_v45 = vmul.u32.u64.high %v1180_v25, %v297_v34, %v1230_v43 }
  0xc9   :  { %v120_v19 = vshrl.u32 %v102_v29, %v118_v2  ;;  %v123_v41 = vadd.s32 127, %v122_v3  ;;  %v218_v11 = vclz %v904_v16  ;;  %v301_v29 = vsel %vm287_vm1, %v298_v18, %v300_v31 }
  0xca   :  { %v237_v8 = vsel %vm152_vm14, %v236_v58, %v212_v37  ;;  %v1236_v49 = vmul.u32.u64.low %v1180_v25, %v301_v29  ;;  %v1237_v28 = vmul.u32.u64.high %v1180_v25, %v301_v29, %v1236_v49  ;;  %v206_v50 = vadd.s32 %v1154_v0, %v1160_v4 }
  0xcb   :  { %v121_v20 = vor.u32 %v120_v19, %v119_v9  ;;  %v124_v35 = vshll.u32 %v123_v41, 23  ;;  %v905_v32 = vadd.s32 4294967294, %v218_v11  ;;  %v293_v22 = vsel %vm287_vm1, %v290_v27, %v292_v30 }
  0xcc   :  { %v911_v24 = vadd.s32 4294967169, %v362_v36  ;;  %v135_v52 = vsel %vm1205_vm3, 0, %v133_v12  ;;  %v239_v37 = vsel %vm1213_vm5, 0, %v237_v8  ;;  %v312_v56 = vadd.s32 1, %v1231_v45 }
  0xcd   :  { %v125_v47 = vor.u32 4788187, %v124_v35  ;;  %vm906_vm6 = vcmp.lt.s32.totalorder %v905_v32, 0  ;;  %v128_v33 = vcvt.s32.f32 %v121_v20  ;;  %v309_v0 = vmul.u32 %v1180_v25, %v293_v22 }
  0xce   :  { %v221_v40 = vsel %vm906_vm6, 0, %v905_v32  ;;  %vm311_vm7 = vc.u32 %v1237_v28, %v1230_v43  ;;  %v368_v4 = vadd.s32 1, %v911_v24  ;;  %v139_v1 = vadd.s32 3, %v135_v52 }
  0xcf   :  { %v126_v51 = vand.u32 2147483647, %v125_v47  ;;  %v222_v53 = vsub.s32 32, %v221_v40  ;;  %v226_v54 = vsub.s32 4294967266, %v221_v40  ;;  %v223_v39 = vshll.u32 %v1200_v57, %v221_v40 }
  0xd0   :  { %v313_v62 = vsel %vm311_vm7, %v312_v56, %v1231_v45  ;;  %vm369_vm8 = vcmp.gt.s32.totalorder %v368_v4, 0  ;;  %v243_v13 = vadd.s32 3, %v239_v37  ;;  %v365_v17 = vand.u32 8388607, %v358_v26 }
  0xd1   :  { %v129_v58 = vmul.f32 %v128_v33, %v126_v51  ;;  %v224_v59 = vshrl.u32 %v206_v50, %v222_v53  ;;  %v227_v60 = vadd.s32 127, %v226_v54  ;;  %v314_v2 = vadd.s32 %v313_v62, %v309_v0 }
  0xd2   :  { %v370_v9 = vsel %vm369_vm8, %v368_v4, 0  ;;  %v1258_v41 = vand.u32 3, %v139_v1  ;;  %v1262_v27 = vand.u32 3, %v243_v13  ;;  %v366_v20 = vor.u32 8388608, %v365_v17 }
  0xd3   :  { %v130_v63 = vxor.u32 2147483648, %v129_v58  ;;  %v225_v3 = vor.u32 %v224_v59, %v223_v39  ;;  %v228_v10 = vshll.u32 %v227_v60, 23  ;;  %v315_v16 = vadd.s32 536870912, %v314_v2 }
  0xd4   :  { %v372_v57 = vand.u32 31, %v370_v9  ;;  %v1266_v30 = vand.u32 3, %v135_v52  ;;  %v1270_v29 = vand.u32 3, %v239_v37  ;;  %vm145_vm9 = vcmp.eq.s32.totalorder %v1258_v41, 2 }
  0xd5   :  { %v131_v25 = vsel %vm48_vm13, %v130_v63, %v129_v58  ;;  %v229_v19 = vor.u32 4788187, %v228_v10  ;;  %v1260_v34 = vshrl.u32 %v315_v16, 30  ;;  %v232_v11 = vcvt.s32.f32 %v225_v3 }
  0xd6   :  { %v134_v18 = vsel %vm1205_vm3, %v1071_v6, %v131_v25  ;;  %v373_v21 = vsub.s32 32, %v372_v57  ;;  %v1274_v45 = vadd.s32 %v1230_v43, %v1237_v28  ;;  %v375_v8 = vshll.u32 %v1029_v38, %v372_v57 }
  0xd7   :  { %961 = vcosq.f32 %v134_v18  ;;  %v230_v12 = vand.u32 2147483647, %v229_v19  ;;  %v317_v36 = vshll.u32 %v1260_v34, 30  ;;  %vm142_vm10 = vcmp.eq.s32.totalorder %v1258_v41, 0 }
  0xd8   :  { %963 = vsinq.f32 %v134_v18  ;;  %v376_v35 = vshrl.u32 %v1030_v42, %v373_v21  ;;  %v379_v31 = vshrl.u32 %v1031_v44, %v373_v21  ;;  %v382_v32 = vshrl.u32 %v1032_v46, %v373_v21 }
  0xd9   :  { %v233_v61 = vmul.f32 %v232_v11, %v230_v12  ;;  %v1276_v47 = vsub.s32 %v314_v2, %v317_v36  ;;  %v385_v49 = vshrl.u32 %v1033_v48, %v373_v21  ;;  %v371_v22 = vshrl.u32 %v370_v9, 5 }
  0xda   :  { %v378_v24 = vshll.u32 %v1030_v42, %v372_v57  ;;  %v381_v51 = vshll.u32 %v1031_v44, %v372_v57  ;;  %vm141_vm11 = vcmp.lt.s32.totalorder %v1258_v41, 2  ;;  %v377_v43 = vor.u32 %v376_v35, %v375_v8 }
  0xdb   :  { %v234_v50 = vxor.u32 2147483648, %v233_v61  ;;  %v320_v33 = vsub.s32 0, %v1276_v47  ;;  %v384_v28 = vshll.u32 %v1032_v46, %v372_v57  ;;  %v1286_v52 = vshll.u32 %v366_v20, 8 }
  0xdc   :  { %vm138_vm12 = vweird.f32 %v1071_v6  ;;  %v380_v53 = vor.u32 %v379_v31, %v378_v24  ;;  %v383_v54 = vor.u32 %v382_v32, %v381_v51  ;;  %v388_v42 = vshrl.u32 %v1034_v55, %v373_v21 }
  0xdd   :  { %v235_v40 = vsel %vm152_vm14, %v234_v50, %v233_v61  ;;  %v908_v37 = vmin.u32 %v320_v33, %v1276_v47  ;;  %v386_v56 = vor.u32 %v385_v49, %v384_v28  ;;  %v387_v46 = vshll.u32 %v1033_v48, %v372_v57 }
  0xde   :  { %v238_v44 = vsel %vm1213_vm5, %v1073_v7, %v235_v40  ;;  %vm557_vm13 = vcmp.eq.s32.totalorder %v1266_v30, 0  ;;  %v374_v58 = vshrl.u32 %v1029_v38, %v373_v21  ;;  %vm390_vm15 = vcmp.lt.s32.totalorder %v371_v22, 1 }
  0xdf   :  { %965 = vcosq.f32 %v238_v44  ;;  %vm392_vm14 = vcmp.lt.s32.totalorder %v371_v22, 3  ;;  %v322_v4 = vclz %v908_v37  ;;  %v389_v55 = vor.u32 %v388_v42, %v387_v46 }
  0xe0   :  { %967 = vsinq.f32 %v238_v44  ;;  %vm393_vm0 = vcmp.lt.s32.totalorder %v371_v22, 4  ;;  %vm560_vm1 = vcmp.eq.s32.totalorder %v1266_v30, 2  ;;  %v394_v59 = vsel %vm390_vm15, %v374_v58, %v377_v43 }
  0xe1   :  { %v962_v0 = vpop.eup %961  ;;  %v395_v48 = vsel %vm393_vm0, %v383_v54, 2102212464  ;;  %v398_v60 = vsel %vm390_vm15, %v377_v43, %v380_v53  ;;  %vm556_vm2 = vcmp.lt.s32.totalorder %v1266_v30, 2  ;;  %v909_v62 = vadd.s32 4294967294, %v322_v4 }
  0xe2   :  { %v964_v5 = vpop.eup %963  ;;  %v146_v39 = vxor.u32 2147483648, %v962_v0  ;;  %v396_v63 = vsel %vm392_vm14, %v380_v53, %v395_v48  ;;  %v399_v1 = vsel %vm393_vm0, %v386_v56, 920167782  ;;  %vm249_vm3 = vcmp.eq.s32.totalorder %v1262_v27, 2 }
  0xe3   :  { %v143_v38 = vxor.u32 2147483648, %v964_v5  ;;  %vm391_vm4 = vcmp.lt.s32.totalorder %v371_v22, 2  ;;  %v400_v3 = vsel %vm392_vm14, %v383_v54, %v399_v1  ;;  %v402_v10 = vsel %vm390_vm15, %v380_v53, %v383_v54 }
  0xe4   :  { %v147_v2 = vsel %vm145_vm9, %v146_v39, %v964_v5  ;;  %vm246_vm5 = vcmp.eq.s32.totalorder %v1262_v27, 0  ;;  %vm910_vm6 = vcmp.lt.s32.totalorder %v909_v62, 0  ;;  %v401_v9 = vsel %vm391_vm4, %v398_v60, %v400_v3 }
  0xe5   :  { %v144_v13 = vsel %vm142_vm10, %v962_v0, %v143_v38  ;;  %v403_v25 = vsel %vm393_vm0, %v389_v55, 1326507024  ;;  %vm245_vm7 = vcmp.lt.s32.totalorder %v1262_v27, 2  ;;  %v325_v17 = vsel %vm910_vm6, 0, %v909_v62 }
  0xe6   :  { %v148_v16 = vsel %vm141_vm11, %v144_v13, %v147_v2  ;;  %v397_v57 = vsel %vm391_vm4, %v394_v59, %v396_v63  ;;  %v404_v18 = vsel %vm392_vm14, %v386_v56, %v403_v25  ;;  %vm242_vm8 = vweird.f32 %v1073_v7 }
  0xe7   :  { %v149_v19 = vsel %vm138_vm12, nan, %v148_v16  ;;  %v326_v21 = vsub.s32 32, %v325_v17  ;;  %v327_v12 = vshll.u32 %v1276_v47, %v325_v17  ;;  %v330_v11 = vsub.s32 4294967266, %v325_v17 }
  0xe8   :  { %v405_v36 = vsel %vm391_vm4, %v402_v10, %v404_v18  ;;  %v1327_v41 = vmul.u32.u64.low %v1286_v52, %v401_v9  ;;  %v1328_v20 = vmul.u32.u64.high %v1286_v52, %v401_v9, %v1327_v41  ;;  %v559_v35 = vsel %vm557_vm13, %v962_v0, %v143_v38  ;;  %874 = vst [vmem:[#allocation5] sm:$0xff] %v149_v19 }
  0xe9   :  { %v328_v61 = vshrl.u32 %v1274_v45, %v326_v21  ;;  %v331_v31 = vadd.s32 127, %v330_v11  ;;  %v1335_v32 = vmul.u32.u64.low %v1286_v52, %v405_v36  ;;  %v1336_v8 = vmul.u32.u64.high %v1286_v52, %v405_v36, %v1335_v32  ;;  %v966_v47 = vpop.eup %965 }
  0xea   :  { %v340_v49 = vsub.s32 4, %v1260_v34  ;;  %v413_v50 = vmul.u32 %v1286_v52, %v397_v57  ;;  %v562_v22 = vsel %vm560_vm1, %v146_v39, %v964_v5  ;;  %vm659_vm9 = vcmp.lt.s32.totalorder %v1270_v29, 2  ;;  %v968_v24 = vpop.eup %967 }
  0xeb   :  { %v250_v51 = vxor.u32 2147483648, %v966_v47  ;;  %v329_v33 = vor.u32 %v328_v61, %v327_v12  ;;  %v332_v43 = vshll.u32 %v331_v31, 23  ;;  %v563_v45 = vsel %vm556_vm2, %v559_v35, %v562_v22 }
  0xec   :  { %v247_v28 = vxor.u32 2147483648, %v968_v24  ;;  %v416_v40 = vadd.s32 1, %v1328_v20  ;;  %v564_v53 = vsel %vm138_vm12, nan, %v563_v45  ;;  %vm660_vm10 = vcmp.eq.s32.totalorder %v1270_v29, 0 }
  0xed   :  { %v251_v52 = vsel %vm249_vm3, %v250_v51, %v968_v24  ;;  %v333_v54 = vor.u32 4788187, %v332_v43  ;;  %v336_v42 = vcvt.s32.f32 %v329_v33  ;;  %vm663_vm11 = vcmp.eq.s32.totalorder %v1270_v29, 2  ;;  %878 = vst [vmem:[#allocation5 + $0x10] sm:$0xff] %v564_v53 }
  0xee   :  { %v248_v30 = vsel %vm246_vm5, %v966_v47, %v247_v28  ;;  %vm415_vm13 = vc.u32 %v1336_v8, %v1327_v41  ;;  %v662_v44 = vsel %vm660_vm10, %v966_v47, %v247_v28  ;;  %v665_v37 = vsel %vm663_vm11, %v250_v51, %v968_v24 }
  0xef   :  { %v252_v6 = vsel %vm245_vm7, %v248_v30, %v251_v52  ;;  %v334_v56 = vand.u32 2147483647, %v333_v54  ;;  %v417_v46 = vsel %vm415_vm13, %v416_v40, %v1328_v20  ;;  %v666_v58 = vsel %vm659_vm9, %v662_v44, %v665_v37 }
  0xf0   :  { %v253_v0 = vsel %vm242_vm8, nan, %v252_v6  ;;  %v418_v4 = vadd.s32 %v417_v46, %v413_v50  ;;  %v667_v55 = vsel %vm242_vm8, nan, %v666_v58  ;;  %vm256_vm12 = vcmp.lt.s32.totalorder %v1082_v14, 0 }
  0xf1   :  { %v337_v5 = vmul.f32 %v336_v42, %v334_v56  ;;  %875 = vst [vmem:[#allocation5 + $0x8] sm:$0xff] %v253_v0  ;;  %879 = vst [vmem:[#allocation5 + $0x18] sm:$0xff] %v667_v55  ;;  %v341_v59 = vsel %vm256_vm12, %v340_v49, %v1260_v34  ;;  %vm255_vm15 = vcmp.le.f32.partialorder %v254_v23, 0.7853982  ;;  %vm346_vm14 = vweird.f32 %v1082_v14 }
  0xf2   :  { %v419_v27 = vadd.s32 536870912, %v418_v4  ;;  %v343_v38 = vsel %vm255_vm15, 0, %v341_v59  ;;  %v414_v16 = vadd.s32 %v1327_v41, %v1336_v8  ;;  %vm360_vm7 = vcmp.lt.s32.totalorder %v1168_v15, 0 }
  0xf3   :  { %v338_v39 = vxor.u32 2147483648, %v337_v5  ;;  %v347_v63 = vadd.s32 3, %v343_v38  ;;  %v761_v13 = vand.u32 3, %v343_v38  ;;  %vm359_vm8 = vcmp.le.f32.partialorder %v358_v26, 0.7853982 }
  0xf4   :  { %v420_v48 = vshrl.u32 %v419_v27, 30 }
  0xf5   :  { %v339_v29 = vsel %vm256_vm12, %v338_v39, %v337_v5  ;;  %v348_v3 = vand.u32 3, %v347_v63  ;;  %vm762_vm4 = vcmp.lt.s32.totalorder %v761_v13, 2  ;;  %vm763_vm5 = vcmp.eq.s32.totalorder %v761_v13, 0 }
  0xf6   :  { %v342_v60 = vsel %vm255_vm15, %v1082_v14, %v339_v29  ;;  %v421_v62 = vshll.u32 %v420_v48, 30  ;;  %vm766_vm6 = vcmp.eq.s32.totalorder %v761_v13, 2  ;;  %v444_v33 = vsub.s32 4, %v420_v48 }
  0xf7   :  { %969 = vcosq.f32 %v342_v60  ;;  %vm349_vm0 = vcmp.lt.s32.totalorder %v348_v3, 2  ;;  %vm350_vm1 = vcmp.eq.s32.totalorder %v348_v3, 0  ;;  %vm353_vm2 = vcmp.eq.s32.totalorder %v348_v3, 2 }
  0xf8   :  { %971 = vsinq.f32 %v342_v60  ;;  %v422_v7 = vsub.s32 %v418_v4, %v421_v62  ;;  %v445_v28 = vsel %vm360_vm7, %v444_v33, %v420_v48 }
  0xf9   :  { %v447_v40 = vsel %vm359_vm8, 0, %v445_v28 }
  0xfa   :  { %v424_v1 = vsub.s32 0, %v422_v7  ;;  %v451_v53 = vadd.s32 3, %v447_v40  ;;  %v864_v54 = vand.u32 3, %v447_v40 }
  0xfc   :  { %v912_v2 = vmin.u32 %v424_v1, %v422_v7  ;;  %v452_v52 = vand.u32 3, %v451_v53  ;;  %vm869_vm10 = vcmp.eq.s32.totalorder %v864_v54, 2  ;;  %vm866_vm13 = vcmp.eq.s32.totalorder %v864_v54, 0 }
  0xfd   :  { %vm865_vm15 = vcmp.lt.s32.totalorder %v864_v54, 2 }
  0xfe   :  { %v426_v10 = vclz %v912_v2  ;;  %vm457_vm9 = vcmp.eq.s32.totalorder %v452_v52, 2  ;;  %vm454_vm11 = vcmp.eq.s32.totalorder %v452_v52, 0  ;;  %vm453_vm12 = vcmp.lt.s32.totalorder %v452_v52, 2 }
 0x100   :  { %v913_v9 = vadd.s32 4294967294, %v426_v10 }
 0x101   :  { %v970_v34 = vpop.eup %969 }
 0x102   :  { %v972_v23 = vpop.eup %971  ;;  %v354_v25 = vxor.u32 2147483648, %v970_v34  ;;  %vm914_vm3 = vcmp.lt.s32.totalorder %v913_v9, 0 }
 0x103   :  { %v351_v17 = vxor.u32 2147483648, %v972_v23  ;;  %v429_v57 = vsel %vm914_vm3, 0, %v913_v9 }
 0x104   :  { %v355_v18 = vsel %vm353_vm2, %v354_v25, %v972_v23  ;;  %v430_v19 = vsub.s32 32, %v429_v57  ;;  %v434_v21 = vsub.s32 4294967266, %v429_v57  ;;  %v431_v11 = vshll.u32 %v422_v7, %v429_v57 }
 0x105   :  { %v352_v12 = vsel %vm350_vm1, %v970_v34, %v351_v17  ;;  %v765_v36 = vsel %vm763_vm5, %v970_v34, %v351_v17  ;;  %v768_v20 = vsel %vm766_vm6, %v354_v25, %v972_v23 }
 0x106   :  { %v356_v35 = vsel %vm349_vm0, %v352_v12, %v355_v18  ;;  %v432_v61 = vshrl.u32 %v414_v16, %v430_v19  ;;  %v435_v31 = vadd.s32 127, %v434_v21  ;;  %v769_v32 = vsel %vm762_vm4, %v765_v36, %v768_v20 }
 0x107   :  { %v357_v41 = vsel %vm346_vm14, nan, %v356_v35  ;;  %v770_v8 = vsel %vm346_vm14, nan, %v769_v32  ;;  %vm450_vm14 = vweird.f32 %v1168_v15 }
 0x108   :  { %v433_v47 = vor.u32 %v432_v61, %v431_v11  ;;  %v436_v49 = vshll.u32 %v435_v31, 23  ;;  %876 = vst [vmem:[#allocation5 + $0x20] sm:$0xff] %v357_v41  ;;  %880 = vst [vmem:[#allocation5 + $0x30] sm:$0xff] %v770_v8 }
 0x10a   :  { %v437_v50 = vor.u32 4788187, %v436_v49  ;;  %v440_v24 = vcvt.s32.f32 %v433_v47 }
 0x10c   :  { %v438_v22 = vand.u32 2147483647, %v437_v50 }
 0x10e   :  { %v441_v51 = vmul.f32 %v440_v24, %v438_v22 }
 0x110   :  { %v442_v43 = vxor.u32 2147483648, %v441_v51 }
 0x112   :  { %v443_v45 = vsel %vm360_vm7, %v442_v43, %v441_v51 }
 0x113   :  { %v446_v14 = vsel %vm359_vm8, %v1168_v15, %v443_v45 }
 0x114   :  { %973 = vcosq.f32 %v446_v14 }
 0x115   :  { %975 = vsinq.f32 %v446_v14 }
 0x11e   :  { %v974_v42 = vpop.eup %973 }
 0x11f   :  { %v976_v30 = vpop.eup %975  ;;  %v458_v44 = vxor.u32 2147483648, %v974_v42 }
 0x120   :  { %v455_v37 = vxor.u32 2147483648, %v976_v30 }
 0x121   :  { %v459_v26 = vsel %vm457_vm9, %v458_v44, %v976_v30  ;;  %v871_v6 = vsel %vm869_vm10, %v458_v44, %v976_v30 }
 0x122   :  { %v456_v56 = vsel %vm454_vm11, %v974_v42, %v455_v37  ;;  %v868_v46 = vsel %vm866_vm13, %v974_v42, %v455_v37 }
 0x123   :  { %v460_v58 = vsel %vm453_vm12, %v456_v56, %v459_v26  ;;  %v872_v0 = vsel %vm865_vm15, %v868_v46, %v871_v6 }
 0x124   :  { %v461_v4 = vsel %vm450_vm14, nan, %v460_v58  ;;  %v873_v55 = vsel %vm450_vm14, nan, %v872_v0 }
 0x125   :  { %877 = vst [vmem:[#allocation5 + $0x28] sm:$0xff] %v461_v4  ;;  %881 = vst [vmem:[#allocation5 + $0x38] sm:$0xff] %v873_v55 }
 0x126   :  { %1010 = shalt.err (!%p1007_p12)
}
 0x127   :  { %s1011_s30 = scalar_lea.hbm %s1397_s2, 1024 }
 0x128   :  { %p1012_p13 = scmp.ne.s32.totalorder %s1397_s2, %s1011_s30  ;;  %p1015_p0 = scmp.lt.u32.totalorder %s1011_s30, %s1397_s2 }
 0x12a   :  { %p1017_p1 = pnand %p1015_p0, %p1012_p13 }
 0x12c   :  { %1020 = shalt.err (!%p1017_p1)
}
 0x12d   :  { %s1036_s7 = smov 512   ;;  %s1037_s8 = smov 32  }
 0x12e   :  { %893 = dma.vmem_to_hbm [thread:$0]  %s888_s1, 1024, %s1397_s2, [#allocation4], %s1036_s7, %s1036_s7, %s1037_s8  }
 0x12f   :  { %1023 = dma.done.wait [#allocation4], 1024  }
 0x130   :  { %1024 = vsyncadd [#allocation4], 4294966272 }
 0x131   :  { %897 = vsyncpa [#allocation3], 1 }
 0x132   :  { %898 = vsyncpa [#allocation4], 1 }

</bundles_post_ra>
